<compile_context>
chip_gen: v5e
topology: v5e:2x2
jax: 0.10.0
libtpu: 0.0.40
codegen_flags: <defaults>
</compile_context>

<pallas_src>
import functools

import jax
import jax.numpy as jnp
from jax.experimental import pallas as pl
from jax.experimental.pallas import tpu as pltpu


def _make_kernel(nb: int, c_in: int, pad: int, hw: int, h2w2: int):
    def kernel(sel_ref, x_ref, o_ref):
        # Merge (nb, C) leading dims (free — last dim untouched) and do a
        # single MXU contraction for the whole block.  sel has exactly one
        # 1.0 per output column, so the result is bit-exact for float inputs.
        lhs = x_ref[...].reshape(nb * c_in, hw)
        res = jnp.dot(lhs, sel_ref[...],
                      preferred_element_type=jnp.float32)       # (nb*C, H2*W2)
        res = res.reshape(nb, c_in, h2w2).astype(o_ref.dtype)    # free split
        if pad > 0:
            # Two whole-block zero-band stores (hoisted; no per-batch unroll).
            zeros = jnp.zeros((nb, pad, h2w2), o_ref.dtype)
            o_ref[:, :pad, :] = zeros
            o_ref[:, pad + c_in:, :] = zeros
        o_ref[:, pad:pad + c_in, :] = res

    return kernel


@functools.lru_cache(maxsize=None)
def _selection_matrix(h: int, w: int, dtype_name: str):
    """0/1 matrix S of shape (H*W, H2*W2): column (i*W2 + j) selects flattened
    input element (2i, 2j).  Values 0/1 are exact in any float dtype, so the
    selection matmul (with f32 accumulation) is bit-exact."""
    h2, w2 = h // 2, w // 2
    hw, h2w2 = h * w, h2 * w2
    src = (2 * jnp.arange(h2, dtype=jnp.int32)[:, None] * w
           + 2 * jnp.arange(w2, dtype=jnp.int32)[None, :]).reshape(1, h2w2)
    rows = jax.lax.broadcasted_iota(jnp.int32, (hw, h2w2), 0)
    return (rows == src).astype(jnp.dtype(dtype_name))


def _pick_batch_block(n: int, c: int, bytes_per_batch: int, sel_bytes: int,
                      vmem_cap: int = 16 << 20) -> int:
    """Pick a batch-block size nb (a divisor of n).

    Targets nb*C >= 256 (MXU row fill on v6e/v7x) and >= ~2 MiB moved per grid
    step (amortizes ~0.35 us/step overhead), while keeping the double-buffered
    per-step footprint (in + out blocks + sel) under a budget that fits every
    generation's scoped VMEM default."""
    desired = max(-(-256 // max(c, 1)),
                  -(-(2 << 20) // max(bytes_per_batch, 1)))
    divisors = [d for d in range(1, n + 1) if n % d == 0]
    fits = [d for d in divisors
            if 2 * d * bytes_per_batch + 2 * sel_bytes <= vmem_cap]
    if not fits:
        return 1
    geq = [d for d in fits if d >= desired]
    return min(geq) if geq else max(fits)


def lambda_layer_shortcut(x: jax.Array, planes: int) -> jax.Array:
    """Pallas equivalent of:
       F.pad(x[:, :, ::2, ::2], (0, 0, 0, 0, planes // 4, planes // 4), 'constant', 0)
    """
    N, C, H, W = x.shape
    if H % 2 or W % 2:
        # TODO(synk): PyTorch ::2 keeps ceil(H/2) rows for odd sizes; the CIFAR
        # ResNet shortcut only ever sees even spatial dims, so we require them.
        raise ValueError("lambda_layer_shortcut requires even H and W")
    if not jnp.issubdtype(x.dtype, jnp.floating):
        # The selection matmul is only guaranteed exact for float inputs.
        raise TypeError("lambda_layer_shortcut expects a floating-point input")

    pad = planes // 4
    c_out = C + 2 * pad
    H2, W2 = H // 2, W // 2
    HW, H2W2 = H * W, H2 * W2

    sel = _selection_matrix(H, W, x.dtype.name)          # cached host constant
    sel_bytes = sel.size * sel.dtype.itemsize
    bytes_per_batch = (C * HW + c_out * H2W2) * x.dtype.itemsize
    nb = _pick_batch_block(N, C, bytes_per_batch, sel_bytes)

    x_flat = x.reshape(N, C, HW)          # free view of contiguous NCHW memory
    out_bytes = N * c_out * H2W2 * x.dtype.itemsize

    out_flat = pl.pallas_call(
        _make_kernel(nb, C, pad, HW, H2W2),
        out_shape=jax.ShapeDtypeStruct((N, c_out, H2W2), x.dtype),
        grid=(N // nb,),
        in_specs=[
            # Selection matrix: constant block index -> resident across steps.
            pl.BlockSpec((HW, H2W2), lambda i: (0, 0)),
            # Only the C real input channels are ever DMA'd.
            pl.BlockSpec((nb, C, HW), lambda i: (i, 0, 0)),
        ],
        out_specs=pl.BlockSpec((nb, c_out, H2W2), lambda i: (i, 0, 0)),
        compiler_params=pltpu.CompilerParams(
            dimension_semantics=("parallel",),
            vmem_limit_bytes=32 << 20),
        cost_estimate=pl.CostEstimate(
            flops=2 * N * C * HW * H2W2,
            transcendentals=0,
            bytes_accessed=x.nbytes + out_bytes + sel_bytes),
    )(sel, x_flat)

    return out_flat.reshape(N, c_out, H2, W2)


if __name__ == "__main__":
    key = jax.random.PRNGKey(0)
    N, C, H, W = 2, 4, 16, 16
    planes = 2 * C  # typical ResNet downsample block: planes = 2 * in_planes
    x = jax.random.normal(key, (N, C, H, W), dtype=jnp.float32)

    out = jax.block_until_ready(lambda_layer_shortcut(x, planes))

    # Pure-JAX reference of the wrapped lambda's semantics.
    pad = planes // 4
    ref = jnp.pad(x[:, :, ::2, ::2], ((0, 0), (pad, pad), (0, 0), (0, 0)))

    assert out.shape == ref.shape, (out.shape, ref.shape)
    assert out.dtype == ref.dtype, (out.dtype, ref.dtype)
    assert jnp.array_equal(out, ref), "mismatch vs reference"

    print("KERNEL_OK")
</pallas_src>

<mosaic_0001>
module attributes {stable_mosaic.version = 11 : i64} {
  func.func @kernel(%arg0: i32, %arg1: memref<256x64xf32, #tpu.memory_space<vmem>>, %arg2: memref<2x4x256xf32, #tpu.memory_space<vmem>>, %arg3: memref<2x8x64xf32, #tpu.memory_space<vmem>>) attributes {dimension_semantics = [#tpu.dimension_semantics<parallel>], iteration_bounds = array<i64: 1>, scalar_prefetch = 0 : i64, scratch_operands = 0 : i64, tpu.core_type = #tpu.core_type<tc>, window_params = [{pipeline_mode = #tpu.pipeline_mode<synchronous>, transform_indices = @transform_0, window_bounds = array<i64: 256, 64>}, {transform_indices = @transform_1, window_bounds = array<i64: 2, 4, 256>}, {transform_indices = @transform_2, window_bounds = array<i64: 2, 8, 64>}]} {
    %c0 = arith.constant 0 : index
    %c0_0 = arith.constant 0 : index
    %c0_1 = arith.constant 0 : index
    %0 = vector.load %arg2[%c0, %c0_0, %c0_1] : memref<2x4x256xf32, #tpu.memory_space<vmem>>, vector<2x4x256xf32>
    %1 = vector.shape_cast %0 : vector<2x4x256xf32> to vector<8x256xf32>
    %c0_2 = arith.constant 0 : index
    %c0_3 = arith.constant 0 : index
    %2 = vector.load %arg1[%c0_2, %c0_3] : memref<256x64xf32, #tpu.memory_space<vmem>>, vector<256x64xf32>
    %cst = arith.constant dense<0.000000e+00> : vector<8x64xf32>
    %3 = tpu.matmul %1, %2, %cst {dimension_numbers = #tpu.dot_dimension_numbers<[1], [0], [0], [1], [0, 0, 1, 1], [], []>} : vector<8x256xf32>, vector<256x64xf32>, vector<8x64xf32> -> vector<8x64xf32>
    %4 = vector.shape_cast %3 : vector<8x64xf32> to vector<2x4x64xf32>
    %cst_4 = arith.constant 0.000000e+00 : f32
    %5 = vector.broadcast %cst_4 : f32 to vector<2x2x64xf32>
    %c0_5 = arith.constant 0 : index
    %c0_6 = arith.constant 0 : index
    %c0_7 = arith.constant 0 : index
    %6 = vector.load %arg3[%c0_5, %c0_6, %c0_7] : memref<2x8x64xf32, #tpu.memory_space<vmem>>, vector<2x2x64xf32>
    tpu.vector_store %arg3[%c0_5, %c0_6, %c0_7], %5 {strides = array<i32>} : memref<2x8x64xf32, #tpu.memory_space<vmem>>, vector<2x2x64xf32>,
    %c0_8 = arith.constant 0 : index
    %c6 = arith.constant 6 : index
    %c0_9 = arith.constant 0 : index
    %7 = vector.load %arg3[%c0_8, %c6, %c0_9] : memref<2x8x64xf32, #tpu.memory_space<vmem>>, vector<2x2x64xf32>
    tpu.vector_store %arg3[%c0_8, %c6, %c0_9], %5 {strides = array<i32>} : memref<2x8x64xf32, #tpu.memory_space<vmem>>, vector<2x2x64xf32>,
    %c0_10 = arith.constant 0 : index
    %c2 = arith.constant 2 : index
    %c0_11 = arith.constant 0 : index
    %8 = vector.load %arg3[%c0_10, %c2, %c0_11] : memref<2x8x64xf32, #tpu.memory_space<vmem>>, vector<2x4x64xf32>
    tpu.vector_store %arg3[%c0_10, %c2, %c0_11], %4 {strides = array<i32>} : memref<2x8x64xf32, #tpu.memory_space<vmem>>, vector<2x4x64xf32>,
    return
  }
  func.func @transform_0(%arg0: i32) -> (i32, i32) {
    %c0_i32 = arith.constant 0 : i32
    %c0_i32_0 = arith.constant 0 : i32
    %c0_i32_1 = arith.constant 0 : i32
    return %c0_i32, %c0_i32_0 : i32, i32
  }
  func.func @transform_1(%arg0: i32) -> (i32, i32, i32) {
    %c0_i32 = arith.constant 0 : i32
    %c0_i32_0 = arith.constant 0 : i32
    %c0_i32_1 = arith.constant 0 : i32
    return %arg0, %c0_i32, %c0_i32_0 : i32, i32, i32
  }
  func.func @transform_2(%arg0: i32) -> (i32, i32, i32) {
    %c0_i32 = arith.constant 0 : i32
    %c0_i32_0 = arith.constant 0 : i32
    %c0_i32_1 = arith.constant 0 : i32
    return %arg0, %c0_i32, %c0_i32_0 : i32, i32, i32
  }
}

</mosaic_0001>

<bundles_post_ra>
// kernel: tpu_custom_call.1
= control target key start
LH: loop header
LB: loop body
LE: loop exit
PB: predicated region body
PF: predicated region fallthrough
CT: control target
= control target key end

     0   :  { %s278_s0 = inlined_call_operand.vmem [shape: f32[256,64], index: 0, kind: input, shape index: {}]   ;;  %s279_s1 = inlined_call_operand.vmem [shape: f32[2,4,256], index: 1, kind: input, shape index: {}]   ;;  %s280_s2 = inlined_call_operand.hbm [shape: f32[2,8,64], index: 2, kind: output, shape index: {}]  }
   0x1   :  { %v29_v0 = vld [vmem:[%s278_s0 + $0x78] sm:$0xff]  ;;  %v28_v2 = vld [vmem:[%s278_s0 + $0x70] sm:$0xff]  ;;  %v27_v4 = vld [vmem:[%s278_s0 + $0x68] sm:$0xff] }
   0x2   :  { %v45_v1 = vld [vmem:[%s278_s0 + $0xf8] sm:$0xff]  ;;  %55 = vmatpush.msra.mxu0 %v29_v0  ;;  %v44_v3 = vld [vmem:[%s278_s0 + $0xf0] sm:$0xff]  ;;  %v43_v5 = vld [vmem:[%s278_s0 + $0xe8] sm:$0xff] }
   0x3   :  { %75 = vmatpush.msra.mxu1 %v45_v1  ;;  %v26_v6 = vld [vmem:[%s278_s0 + $0x60] sm:$0xff]  ;;  %v25_v8 = vld [vmem:[%s278_s0 + $0x58] sm:$0xff]  ;;  %v24_v10 = vld [vmem:[%s278_s0 + $0x50] sm:$0xff] }
   0x4   :  { %56 = vmatpush.msra.mxu0 %v28_v2  ;;  %v42_v7 = vld [vmem:[%s278_s0 + $0xe0] sm:$0xff]  ;;  %v41_v9 = vld [vmem:[%s278_s0 + $0xd8] sm:$0xff]  ;;  %v40_v11 = vld [vmem:[%s278_s0 + $0xd0] sm:$0xff] }
   0x5   :  { %76 = vmatpush.msra.mxu1 %v44_v3  ;;  %v23_v12 = vld [vmem:[%s278_s0 + $0x48] sm:$0xff]  ;;  %v12_v14 = vld [vmem:[%s279_s1] sm:$0xff] }
   0x6   :  { %57 = vmatpush.msra.mxu0 %v27_v4  ;;  %v39_v13 = vld [vmem:[%s278_s0 + $0xc8] sm:$0xff]  ;;  %48 = vst [vmem:[#allocation1] ss:$2 sm:$0xff] %v12_v14 }
   0x7   :  { %77 = vmatpush.msra.mxu1 %v43_v5  ;;  %v13_v15 = vld [vmem:[%s279_s1 + $0x8] sm:$0xff] }
   0x8   :  { %58 = vmatpush.msra.mxu0 %v26_v6 }
   0x9   :  { %78 = vmatpush.msra.mxu1 %v42_v7 }
   0xa   :  { %59 = vmatpush.msra.mxu0 %v25_v8 }
   0xb   :  { %79 = vmatpush.msra.mxu1 %v41_v9 }
   0xc   :  { %60 = vmatpush.msra.mxu0 %v24_v10 }
   0xd   :  { %80 = vmatpush.msra.mxu1 %v40_v11 }
   0xe   :  { %7 = vsyncpa [#allocation3], 0  ;;  %v22_v16 = vld [vmem:[%s278_s0 + $0x40] sm:$0xff]  ;;  %50 = vst [vmem:[#allocation1 + $0x1] ss:$2 sm:$0xff] %v13_v15  ;;  %61 = vmatpush.msra.mxu0 %v23_v12  ;;  %v21_v18 = vld [vmem:[%s278_s0 + $0x38] sm:$0xff] }
   0xf   :  { %v38_v17 = vld [vmem:[%s278_s0 + $0xc0] sm:$0xff]  ;;  %81 = vmatpush.msra.mxu1 %v39_v13  ;;  %v37_v19 = vld [vmem:[%s278_s0 + $0xb8] sm:$0xff]  ;;  %v20_v20 = vld [vmem:[%s278_s0 + $0x30] sm:$0xff]  ;;  %vm98_vm0 = vcmask 517120   ;;  %v154_v36 = vmov 0.0   ;;  %s155_s20 = smov [#allocation2]  }
  0x10   :  { %62 = vmatpush.msra.mxu0 %v22_v16  ;;  %v36_v21 = vld [vmem:[%s278_s0 + $0xb0] sm:$0xff]  ;;  %v19_v22 = vld [vmem:[%s278_s0 + $0x28] sm:$0xff]  ;;  %v18_v24 = vld [vmem:[%s278_s0 + $0x20] sm:$0xff]  ;;  %99 = vst.msk [vmem:[#allocation2] sm:$0x3] %vm98_vm0, %v154_v36  ;;  %s110_s1 = sshll.u32 %s155_s20, 4  ;;  %s111_s1 = int_to_ptr.vmem [resolvable:$true] %s110_s1 }
  0x11   :  { %82 = vmatpush.msra.mxu1 %v38_v17  ;;  %v35_v23 = vld [vmem:[%s278_s0 + $0xa8] sm:$0xff]  ;;  %v34_v25 = vld [vmem:[%s278_s0 + $0xa0] sm:$0xff]  ;;  %v17_v26 = vld [vmem:[%s278_s0 + $0x18] sm:$0xff]  ;;  %100 = vst.msk [vmem:[#allocation2 + $0x8] sm:$0x3] %vm98_vm0, %v154_v36  ;;  %vm103_vm1 = vcmask 519168  }
  0x12   :  { %63 = vmatpush.msra.mxu0 %v21_v18  ;;  %v33_v27 = vld [vmem:[%s278_s0 + $0x98] sm:$0xff]  ;;  %v16_v28 = vld [vmem:[%s278_s0 + $0x10] sm:$0xff]  ;;  %v15_v30 = vld [vmem:[%s278_s0 + $0x8] sm:$0xff]  ;;  %101 = vst.msk [vmem:[#allocation2 + $0x6] sm:$0x3] %vm98_vm0, %v154_v36  ;;  %s156_s23 = smov 128  }
  0x13   :  { %83 = vmatpush.msra.mxu1 %v37_v19  ;;  %v32_v29 = vld [vmem:[%s278_s0 + $0x90] sm:$0xff]  ;;  %v31_v31 = vld [vmem:[%s278_s0 + $0x88] sm:$0xff]  ;;  %v14_v32 = vld [vmem:[%s278_s0] sm:$0xff]  ;;  %102 = vst.msk [vmem:[#allocation2 + $0xe] sm:$0x3] %vm98_vm0, %v154_v36  ;;  %s157_s24 = smov 8  }
  0x14   :  { %64 = vmatpush.msra.mxu0 %v20_v20  ;;  %v30_v33 = vld [vmem:[%s278_s0 + $0x80] sm:$0xff]  ;;  %s112_s0 = sshll.u32 %s280_s2, 4  ;;  %s113_s0 = int_to_ptr.hbm [resolvable:$true] %s112_s0 }
  0x15   :  { %84 = vmatpush.msra.mxu1 %v36_v21  ;;  %v51_v34 = vld.sshfl [vmem:[#allocation1] sm:$0xff pattern:$0x75316420]  ;;  %v52_v35 = vld.sshfl [vmem:[#allocation1 + $0x8] sm:$0xff pattern:$0x75316420] }
  0x16   :  { %65 = vmatpush.msra.mxu0 %v19_v22 }
  0x17   :  { %85 = vmatpush.msra.mxu1 %v35_v23 }
  0x18   :  { %66 = vmatpush.msra.mxu0 %v18_v24 }
  0x19   :  { %86 = vmatpush.msra.mxu1 %v34_v25 }
  0x1a   :  { %67 = vmatpush.msra.mxu0 %v17_v26 }
  0x1b   :  { %87 = vmatpush.msra.mxu1 %v33_v27 }
  0x1c   :  { %68 = vmatpush.msra.mxu0 %v16_v28 }
  0x1d   :  { %88 = vmatpush.msra.mxu1 %v32_v29 }
  0x1e   :  { %69 = vmatpush.msra.mxu0 %v15_v30 }
  0x1f   :  { %89 = vmatpush.msra.mxu1 %v31_v31 }
  0x20   :  { %70 = vmatpush.msra.mxu0 %v14_v32 }
  0x21   :  { %90 = vmatpush.msra.mxu1 %v30_v33  ;;  %71 = vmatmul.f32.vlgmr.msra.gmra.mxu0 %v51_v34 }
  0x22   :  { %91 = vmatmul.f32.vlgmr.msra.gmra.mxu1 %v52_v35 }
  0x9e   :  { %v72_v37 = vpop.f32.mrf.mxu0 }
  0x9f   :  { %v92_v38 = vpop.f32.mrf.mxu1 }
  0xa0   :  { %v93_v39 = vadd.f32 %v92_v38, %v72_v37 }
  0xa2   :  { %v96_v40 = vrot.slane %v93_v39, 4  ;;  %104 = vst.msk [vmem:[#allocation2 + $0x2] sm:$0xf] %vm103_vm1, %v93_v39 }
  0xa4   :  { %105 = vst.msk [vmem:[#allocation2 + $0xa] sm:$0xf] %vm103_vm1, %v96_v40 }
  0xa5   :  { %118 = dma.vmem_to_hbm [thread:$0]  %s111_s1, 256, %s113_s0, [#allocation3], %s156_s23, %s156_s23, %s157_s24  }
  0xa6   :  { %152 = dma.done.wait [#allocation3], 256  }
  0xa7   :  { %153 = vsyncadd [#allocation3], 4294967040 }
  0xa8   :  { %123 = vsyncpa [#allocation3], 1 }

</bundles_post_ra>
